<compile_context>
chip_gen: v5e
topology: v5e:2x2
jax: 0.10.0
libtpu: 0.0.40
codegen_flags: <defaults>
</compile_context>

<pallas_src>
import jax
import jax.numpy as jnp
from jax.experimental import pallas as pl
from jax.experimental.pallas import tpu as pltpu  # noqa: F401  (TPU backend)


def _round_up(n: int, m: int) -> int:
    return ((n + m - 1) // m) * m


def _full_spec(shape):
    # Whole array as one VMEM-resident block (gridless call).
    return pl.BlockSpec(shape, lambda: (0,) * len(shape))


def _ltc_kernel(xh_ref, h_ref, t_ref, w_ref, params_ref, out_ref):
    """Single-block LTC cell update (all operands VMEM resident).

    xh_ref     : (B, D_in + H)   concatenated [x, h]   (matmul dtype)
    h_ref      : (B, Hp)         zero-padded hidden state, f32
    t_ref      : (B, 1)          per-sample time step, f32
    w_ref      : (D_in + H, Hp)  stacked [W_i^T ; W_h^T], lane-padded
    params_ref : (3, Hp)         rows = [bias, 1/(softplus(tau)+1e-8), A]
    out_ref    : (B, Hp)         new hidden state (padded), f32
    """
    # One fused MXU matmul replaces w_i(x) + w_h(h).
    pre = jnp.dot(xh_ref[...], w_ref[...],
                  preferred_element_type=jnp.float32)           # (B, Hp) f32

    bias = params_ref[0:1, :]       # (1, Hp)
    inv_tau = params_ref[1:2, :]    # (1, Hp)  precomputed 1/(softplus(tau)+1e-8)
    a = params_ref[2:3, :]          # (1, Hp)

    f = jnp.tanh(pre + bias)                                    # (B, Hp) f32

    h = h_ref[...]                                              # (B, Hp)
    t = t_ref[...]                                              # (B, 1) broadcasts

    num = h + t * f * a
    den = 1.0 + t * (inv_tau + f)
    # Exact reciprocal on the EUP slot + a VPU multiply instead of a vector divide.
    out_ref[...] = (num * pl.reciprocal(den, approx=False)).astype(out_ref.dtype)


def prepare_ltc_params(w_i, w_h, bias, tau, A, *, matmul_dtype=jnp.float32):
    """One-time parameter preprocessing (call once, NOT per timestep).

    Args (PyTorch layouts):
      w_i : (H, D_in), w_h : (H, H), bias/tau/A : (H,)
    Returns:
      w_stack : (D_in + H, Hp)   [W_i^T ; W_h^T], hidden axis padded to 128
      params  : (3, Hp)          rows = [bias, 1/(softplus(tau)+1e-8), A]
    """
    H, D_in = w_i.shape
    assert w_h.shape == (H, H)
    Hp = _round_up(H, 128)              # lane-dense hidden axis
    pad_h = Hp - H

    # [x, h] @ w_stack == x @ W_i^T + h @ W_h^T  (transposed & stacked once).
    w_stack = jnp.concatenate([w_i.T, w_h.T], axis=0)           # (D_in + H, H)
    w_stack = jnp.pad(w_stack, ((0, 0), (0, pad_h))).astype(matmul_dtype)

    inv_tau = 1.0 / (jax.nn.softplus(tau) + 1e-8)               # hoisted out of kernel
    params = jnp.stack([
        jnp.pad(bias.astype(jnp.float32), (0, pad_h)),
        jnp.pad(inv_tau.astype(jnp.float32), (0, pad_h)),
        jnp.pad(A.astype(jnp.float32), (0, pad_h)),
    ], axis=0)                                                  # (3, Hp)
    return w_stack, params


@jax.jit
def ltc_cell_forward(x, h, t, w_stack, params):
    """One LTC cell step: h_new = (h + t*f*A) / (1 + t*(1/tau + f)).

    x : (B, D_in) f32, h : (B, H) f32, t : (B,) or (B, 1) f32.
    w_stack, params : outputs of prepare_ltc_params (reused every step).
    """
    B, D_in = x.shape
    H = h.shape[1]
    K, Hp = w_stack.shape
    assert K == D_in + H

    h32 = h.astype(jnp.float32)
    h_pad = h32 if Hp == H else jnp.pad(h32, ((0, 0), (0, Hp - H)))
    # Concatenate once so the kernel issues a single MXU matmul (K = D_in + H).
    xh = jnp.concatenate([x.astype(w_stack.dtype),
                          h.astype(w_stack.dtype)], axis=1)     # (B, K)
    t2 = t.reshape(B, 1).astype(jnp.float32)

    out = pl.pallas_call(
        _ltc_kernel,
        out_shape=jax.ShapeDtypeStruct((B, Hp), jnp.float32),
        grid=(),
        in_specs=[
            _full_spec((B, K)),    # [x, h]
            _full_spec((B, Hp)),   # h (lane-padded)
            _full_spec((B, 1)),    # t
            _full_spec((K, Hp)),   # stacked weights
            _full_spec((3, Hp)),   # packed [bias, inv_tau, A]
        ],
        out_specs=_full_spec((B, Hp)),
    )(xh, h_pad, t2, w_stack, params)

    return out if Hp == H else out[:, :H]


def _xavier_uniform(key, shape):
    # Matches torch.nn.init.xavier_uniform_ for a 2D (fan_out, fan_in) weight.
    fan_out, fan_in = shape
    limit = jnp.sqrt(6.0 / (fan_in + fan_out))
    return jax.random.uniform(key, shape, jnp.float32, -limit, limit)


def ltc_reference(x, h, t, w_i, w_h, bias, tau, A):
    f = jnp.tanh(x @ w_i.T + h @ w_h.T + bias)
    tau_sp = jax.nn.softplus(tau) + 1e-8
    return (h + t * f * A) / (1.0 + t * (1.0 / tau_sp + f))


if __name__ == "__main__":
    in_features = 16
    hidden_features = 32
    batch = 8

    key = jax.random.PRNGKey(0)
    k_wi, k_wh, k_x, k_h, k_t = jax.random.split(key, 5)

    # Parameters (same shapes / init rules as LTCCell.__init__ / _init_weights):
    w_i = _xavier_uniform(k_wi, (hidden_features, in_features))
    w_h = _xavier_uniform(k_wh, (hidden_features, hidden_features))
    bias = jnp.zeros((hidden_features,), jnp.float32)
    tau = jnp.zeros((hidden_features,), jnp.float32)
    A = jnp.ones((hidden_features,), jnp.float32)

    # Inputs
    x = jax.random.normal(k_x, (batch, in_features), jnp.float32)
    h = jax.random.normal(k_h, (batch, hidden_features), jnp.float32)
    t = jax.random.uniform(k_t, (batch, 1), jnp.float32, 0.1, 1.0)

    # One-time parameter prep (transpose+stack weights, softplus, 1/tau, packing).
    # For v6e/v7x pass matmul_dtype=jnp.bfloat16 (elementwise math stays f32).
    w_stack, params = prepare_ltc_params(w_i, w_h, bias, tau, A)

    h_new = ltc_cell_forward(x, h, t, w_stack, params)
    h_new = jax.block_until_ready(h_new)

    ref = ltc_reference(x, h, t, w_i, w_h, bias, tau, A)
    assert h_new.shape == (batch, hidden_features)
    assert jnp.allclose(h_new, ref, atol=1e-5, rtol=1e-5), (
        f"max err {jnp.max(jnp.abs(h_new - ref))}")

    print("KERNEL_OK")
</pallas_src>

<mosaic_0001>
module attributes {stable_mosaic.version = 11 : i64} {
  func.func @_ltc_kernel(%arg0: memref<8x48xf32, #tpu.memory_space<vmem>>, %arg1: memref<8x128xf32, #tpu.memory_space<vmem>>, %arg2: memref<8x1xf32, #tpu.memory_space<vmem>>, %arg3: memref<48x128xf32, #tpu.memory_space<vmem>>, %arg4: memref<3x128xf32, #tpu.memory_space<vmem>>, %arg5: memref<8x128xf32, #tpu.memory_space<vmem>>) attributes {dimension_semantics = [], scalar_prefetch = 0 : i64, scratch_operands = 0 : i64, tpu.core_type = #tpu.core_type<tc>} {
    %c0 = arith.constant 0 : index
    %c0_0 = arith.constant 0 : index
    %0 = vector.load %arg0[%c0, %c0_0] : memref<8x48xf32, #tpu.memory_space<vmem>>, vector<8x48xf32>
    %c0_1 = arith.constant 0 : index
    %c0_2 = arith.constant 0 : index
    %1 = vector.load %arg3[%c0_1, %c0_2] : memref<48x128xf32, #tpu.memory_space<vmem>>, vector<48x128xf32>
    %cst = arith.constant dense<0.000000e+00> : vector<8x128xf32>
    %2 = tpu.matmul %0, %1, %cst {dimension_numbers = #tpu.dot_dimension_numbers<[1], [0], [0], [1], [0, 0, 1, 1], [], []>} : vector<8x48xf32>, vector<48x128xf32>, vector<8x128xf32> -> vector<8x128xf32>
    %c0_3 = arith.constant 0 : index
    %c0_4 = arith.constant 0 : index
    %3 = vector.load %arg4[%c0_3, %c0_4] : memref<3x128xf32, #tpu.memory_space<vmem>>, vector<1x128xf32>
    %c1 = arith.constant 1 : index
    %c0_5 = arith.constant 0 : index
    %4 = vector.load %arg4[%c1, %c0_5] : memref<3x128xf32, #tpu.memory_space<vmem>>, vector<1x128xf32>
    %c2 = arith.constant 2 : index
    %c0_6 = arith.constant 0 : index
    %5 = vector.load %arg4[%c2, %c0_6] : memref<3x128xf32, #tpu.memory_space<vmem>>, vector<1x128xf32>
    %6 = vector.broadcast %3 : vector<1x128xf32> to vector<8x128xf32>
    %7 = arith.addf %2, %6 : vector<8x128xf32>
    %8 = math.tanh %7 : vector<8x128xf32>
    %c0_7 = arith.constant 0 : index
    %c0_8 = arith.constant 0 : index
    %9 = vector.load %arg1[%c0_7, %c0_8] : memref<8x128xf32, #tpu.memory_space<vmem>>, vector<8x128xf32>
    %c0_9 = arith.constant 0 : index
    %c0_10 = arith.constant 0 : index
    %10 = vector.load %arg2[%c0_9, %c0_10] : memref<8x1xf32, #tpu.memory_space<vmem>>, vector<8x1xf32>
    %11 = vector.broadcast %10 : vector<8x1xf32> to vector<8x128xf32>
    %12 = arith.mulf %11, %8 : vector<8x128xf32>
    %13 = vector.broadcast %5 : vector<1x128xf32> to vector<8x128xf32>
    %14 = arith.mulf %12, %13 : vector<8x128xf32>
    %15 = arith.addf %9, %14 : vector<8x128xf32>
    %16 = vector.broadcast %4 : vector<1x128xf32> to vector<8x128xf32>
    %17 = arith.addf %16, %8 : vector<8x128xf32>
    %18 = vector.broadcast %10 : vector<8x1xf32> to vector<8x128xf32>
    %19 = arith.mulf %18, %17 : vector<8x128xf32>
    %cst_11 = arith.constant 1.000000e+00 : f32
    %20 = vector.broadcast %cst_11 : f32 to vector<8x128xf32>
    %21 = arith.addf %20, %19 : vector<8x128xf32>
    %22 = tpu.reciprocal %21 : vector<8x128xf32> -> vector<8x128xf32>
    %23 = arith.mulf %15, %22 : vector<8x128xf32>
    %c0_12 = arith.constant 0 : index
    %c0_13 = arith.constant 0 : index
    %24 = vector.load %arg5[%c0_12, %c0_13] : memref<8x128xf32, #tpu.memory_space<vmem>>, vector<8x128xf32>
    tpu.vector_store %arg5[%c0_12, %c0_13], %23 {strides = array<i32>} : memref<8x128xf32, #tpu.memory_space<vmem>>, vector<8x128xf32>,
    return
  }
}

</mosaic_0001>

<bundles_post_ra>
// kernel: ltc_cell_forward.1
= control target key start
LH: loop header
LB: loop body
LE: loop exit
PB: predicated region body
PF: predicated region fallthrough
CT: control target
= control target key end

     0   :  { %10 = vsyncpa [#allocation3], 0  ;;  %s246_s0 = inlined_call_operand.vmem [shape: f32[8,48], index: 0, kind: input, shape index: {}]   ;;  %s247_s1 = inlined_call_operand.vmem [shape: f32[8,128], index: 1, kind: input, shape index: {}]   ;;  %s248_s2 = inlined_call_operand.vmem [shape: f32[8,1], index: 2, kind: input, shape index: {}]   ;;  %s249_s3 = inlined_call_operand.hbm [shape: f32[48,128], index: 3, kind: input, shape index: {}]   ;;  %s250_s4 = inlined_call_operand.vmem [shape: f32[3,128], index: 4, kind: input, shape index: {}]   ;;  %s251_s5 = inlined_call_operand.hbm [shape: f32[8,128], index: 5, kind: output, shape index: {}]  }
   0x1   :  { %11 = vsyncpa [#allocation4], 0  ;;  %s22_s20 = sshll.u32 %s249_s3, 4  ;;  %s187_s21 = smov [#allocation2]   ;;  %s23_s20 = int_to_ptr.hbm [resolvable:$true] %s22_s20 }
   0x2   :  { %s24_s22 = sshll.u32 %s187_s21, 4  ;;  %s188_s23 = smov 128   ;;  %s25_s22 = int_to_ptr.vmem [resolvable:$true] %s24_s22 }
   0x3   :  { %s189_s24 = smov 8  }
   0x4   :  { %30 = dma.hbm_to_vmem [thread:$0]  %s23_s20, 768, %s25_s22, [#allocation3], %s188_s23, %s188_s23, %s189_s24  }
   0x5   :  { %183 = dma.done.wait [#allocation3], 768  }
   0x6   :  { %184 = vsyncadd [#allocation3], 4294966528  ;;  %v190_v0 = vmov 0   ;;  %v43_v1 = vld [vmem:[#allocation2 + $0x28] sm:$0xff]  ;;  %v42_v2 = vld [vmem:[#allocation2 + $0x20] sm:$0xff]  ;;  %vm48_vm0 = vcmask 392192  }
   0x7   :  { %127 = vset.pattern.permute.xlu0 %v190_v0  ;;  %62 = vmatpush.msra.mxu0 %v43_v1  ;;  %v41_v3 = vld [vmem:[#allocation2 + $0x18] sm:$0xff]  ;;  %v74_v4 = vld [vmem:[%s248_s2] sm:$0xff]  ;;  %v40_v5 = vld [vmem:[#allocation2 + $0x10] sm:$0xff]  ;;  %s191_s9 = smov [#allocation5]  }
   0x8   :  { %77 = vperm.xlu0 %127, %v74_v4   ;;  %v39_v6 = vld [vmem:[#allocation2 + $0x8] sm:$0xff]  ;;  %v38_v7 = vld [vmem:[#allocation2] sm:$0xff]  ;;  %s109_s10 = sshll.u32 %s191_s9, 4  ;;  %s110_s10 = int_to_ptr.vmem [resolvable:$true] %s109_s10 }
   0x9   :  { %63 = vmatpush.msra.mxu0 %v42_v2  ;;  %v37_v8 = vld [vmem:[%s246_s0] sm:$0xff] }
   0xa   :  { %v128_v9 = vld [vmem:[%s250_s4] ss:$0 sm:$0xff]  ;;  %v130_v12 = vld [vmem:[%s250_s4 + $0x1] ss:$0 sm:$0xff]  ;;  %v129_v20 = vld [vmem:[%s250_s4 + $0x2] ss:$0 sm:$0xff] }
   0xb   :  { %64 = vmatpush.msra.mxu0 %v41_v3  ;;  %v73_v27 = vld [vmem:[%s247_s1] sm:$0xff]  ;;  %s111_s4 = sshll.u32 %s251_s5, 4  ;;  %s112_s4 = int_to_ptr.hbm [resolvable:$true] %s111_s4 }
   0xd   :  { %65 = vmatpush.msra.mxu0 %v40_v5 }
   0xf   :  { %66 = vmatpush.msra.mxu0 %v39_v6 }
  0x11   :  { %67 = vmatpush.msra.mxu0 %v38_v7 }
  0x12   :  { %121 = vmatmul.msk.f32.vlgmr.msra.gmra.mxu0 %vm48_vm0, %v37_v8 }
  0x7a   :  { %v78_v15 = vpop.permute.xlu0 %77 }
  0x8f   :  { %v69_v10 = vpop.f32.mrf.mxu0 }
  0x90   :  { %v70_v11 = vadd.f32 %v128_v9, %v69_v10 }
  0x92   :  { %131 = vtanh.f32 %v70_v11 }
  0x98   :  { %v132_v13 = vpop.eup %131 }
  0x99   :  { %v85_v14 = vadd.f32 %v132_v13, %v130_v12  ;;  %v80_v19 = vmul.f32 %v132_v13, %v78_v15 }
  0x9b   :  { %v86_v16 = vmul.f32 %v85_v14, %v78_v15  ;;  %v82_v24 = vmul.f32 %v129_v20, %v80_v19 }
  0x9d   :  { %v87_v17 = vadd.f32 1.0, %v86_v16  ;;  %v83_v30 = vadd.f32 %v82_v24, %v73_v27 }
  0x9f   :  { %133 = vrcp.f32 %v87_v17  ;;  %v99_v23 = vand.u32 2147483648, %v87_v17  ;;  %v97_v26 = vand.u32 2147483647, %v87_v17  ;;  %vm93_vm2 = vweird.f32 %v87_v17 }
  0xa1   :  { %v100_v29 = vor.u32 1.1754944e-38, %v99_v23  ;;  %vm98_vm4 = vcmp.eq.f32.partialorder %v97_v26, 8.507059e+37 }
  0xa5   :  { %v134_v18 = vpop.eup %133 }
  0xa6   :  { %v89_v21 = vmul.f32 %v134_v18, %v87_v17  ;;  %vm94_vm1 = vweird.f32 %v134_v18 }
  0xa7   :  { %vm95_vm3 = vmor %vm93_vm2, %vm94_vm1 }
  0xa8   :  { %v90_v22 = vsub.f32 1.0, %v89_v21 }
  0xaa   :  { %v91_v25 = vmul.f32 %v134_v18, %v90_v22 }
  0xac   :  { %v92_v28 = vadd.f32 %v134_v18, %v91_v25 }
  0xae   :  { %v96_v31 = vsel %vm95_vm3, %v134_v18, %v92_v28 }
  0xaf   :  { %v101_v32 = vsel %vm98_vm4, %v100_v29, %v96_v31 }
  0xb0   :  { %v102_v33 = vmul.f32 %v101_v32, %v83_v30 }
  0xb2   :  { %103 = vst [vmem:[#allocation5] sm:$0xff] %v102_v33 }
  0xb3   :  { %114 = dma.vmem_to_hbm [thread:$0]  %s110_s10, 128, %s112_s4, [#allocation4]  }
  0xb4   :  { %185 = dma.done.wait [#allocation4], 128  }
  0xb5   :  { %186 = vsyncadd [#allocation4], 4294967168 }
  0xb6   :  { %119 = vsyncpa [#allocation3], 1 }
  0xb7   :  { %120 = vsyncpa [#allocation4], 1 }

</bundles_post_ra>
